<compile_context>
chip_gen: v7x
topology: tpu7x:2x2x1
jax: 0.10.0
libtpu: 0.0.40
codegen_flags: <defaults>
</compile_context>

<pallas_src>
import functools
import math

import jax
import jax.numpy as jnp
from jax import lax
from jax.experimental import pallas as pl
from jax.experimental.pallas import tpu as pltpu

SPLIT_SIZES = (64, 160, 160, 16, 320, 64, 128)
C_TOTAL = sum(SPLIT_SIZES)               # 912
LAST_START = C_TOTAL - SPLIT_SIZES[-1]   # 784: channels >= 784 get the where() op
NEG_SLOPE = -0.15


def _tail_where_kernel(x_ref, o_ref):
    # Block covers only the last-chunk columns: apply the leaky-relu-like op.
    t = x_ref[...]
    o_ref[...] = jnp.where(t > 0, t, t * NEG_SLOPE)


def _masked_stream_kernel(head, x_ref, o_ref):
    # Fallback when the flattened split boundary cannot be lane-block aligned
    # (not hit for H*W=16).  Single combined predicate, no nested where.
    x = x_ref[...]
    col = lax.broadcasted_iota(jnp.int32, x.shape, 1)
    o_ref[...] = jnp.where((col < head) | (x > 0), x, x * NEG_SLOPE)


def _pick_tail_block_cols(head_flat, tail_flat):
    # Largest lane-aligned column width that tiles the tail exactly and puts
    # the tail start on a block boundary.
    g = math.gcd(head_flat, tail_flat)
    for d in (2048, 1024, 512, 256, 128):
        if g % d == 0:
            return d
    return 0


def _pick_rows(n, cap):
    # Near-equal row blocks, sublane (8) aligned for partial tiles.
    if n <= cap:
        return n
    steps = pl.cdiv(n, cap)
    rows = pl.cdiv(n, steps)
    return max(8, ((rows + 7) // 8) * 8)


def model_forward(x):
    """x: (N, C_TOTAL, H, W) float32, NCHW layout.

    For the full HBM-traffic win, callers should donate x
    (jax.jit(model_forward, donate_argnums=(0,))).
    """
    N, C, H, W = x.shape
    assert C == C_TOTAL, f"expected {C_TOTAL} channels, got {C}"
    flat = C * H * W
    head_flat = LAST_START * H * W        # flattened element where the last chunk begins
    tail_flat = flat - head_flat
    itemsize = jnp.dtype(x.dtype).itemsize

    x_flat = x.reshape(N, flat)           # free reshape: NCHW is contiguous

    tcols = _pick_tail_block_cols(head_flat, tail_flat)
    if tcols:
        # Tail-only path: alias input to output; the head never moves.
        head_blocks = head_flat // tcols
        col_tiles = tail_flat // tcols
        rows = _pick_rows(N, max(8, (1 << 20) // (tcols * itemsize)))
        grid = (pl.cdiv(N, rows), col_tiles)
        out_flat = pl.pallas_call(
            _tail_where_kernel,
            out_shape=jax.ShapeDtypeStruct((N, flat), x.dtype),
            grid=grid,
            in_specs=[pl.BlockSpec((rows, tcols),
                                   lambda i, j: (i, head_blocks + j))],
            out_specs=pl.BlockSpec((rows, tcols),
                                   lambda i, j: (i, head_blocks + j)),
            input_output_aliases={0: 0},
            compiler_params=pltpu.CompilerParams(
                dimension_semantics=("parallel", "parallel")),
            cost_estimate=pl.CostEstimate(
                flops=3 * N * tail_flat,
                transcendentals=0,
                bytes_accessed=2 * N * tail_flat * itemsize),
        )(x_flat)
    else:
        # Streaming fallback (whole rows), masked at the split boundary.
        rows = _pick_rows(N, max(8, (2 << 20) // (flat * itemsize)))
        grid = (pl.cdiv(N, rows),)
        out_flat = pl.pallas_call(
            functools.partial(_masked_stream_kernel, head_flat),
            out_shape=jax.ShapeDtypeStruct((N, flat), x.dtype),
            grid=grid,
            in_specs=[pl.BlockSpec((rows, flat), lambda i: (i, 0))],
            out_specs=pl.BlockSpec((rows, flat), lambda i: (i, 0)),
            compiler_params=pltpu.CompilerParams(
                dimension_semantics=("parallel",),
                vmem_limit_bytes=32 << 20),
            cost_estimate=pl.CostEstimate(
                flops=3 * N * flat,
                transcendentals=0,
                bytes_accessed=2 * N * flat * itemsize),
        )(x_flat)
    return out_flat.reshape(N, C, H, W)


def model_forward_ref(x):
    """Pure-JAX reference matching the PyTorch forward."""
    chunks = []
    start = 0
    for s in SPLIT_SIZES:
        chunks.append(x[:, start:start + s])
        start += s
    x7 = chunks[-1]
    x10 = jnp.where(x7 > 0, x7, x7 * NEG_SLOPE)
    return jnp.concatenate(chunks[:-1] + [x10], axis=1)


if __name__ == "__main__":
    key = jax.random.PRNGKey(0)
    # Small batch/spatial; channel count fixed by the split sizes in forward().
    x = jax.random.normal(key, (2, C_TOTAL, 4, 4), dtype=jnp.float32)

    # Compute the reference first: x is donated to the kernel call below.
    ref = jax.block_until_ready(model_forward_ref(x))

    fwd = jax.jit(model_forward, donate_argnums=(0,))
    out = jax.block_until_ready(fwd(x))

    assert out.shape == ref.shape == (2, C_TOTAL, 4, 4)
    assert jnp.allclose(out, ref, atol=1e-6, rtol=1e-6)

    print("KERNEL_OK")
</pallas_src>

<mosaic_0001>
module attributes {stable_mosaic.version = 11 : i64} {
  func.func @_tail_where_kernel(%arg0: i32, %arg1: i32, %arg2: memref<2x256xf32, #tpu.memory_space<vmem>>, %arg3: memref<2x256xf32, #tpu.memory_space<vmem>>) attributes {dimension_semantics = [#tpu.dimension_semantics<parallel>, #tpu.dimension_semantics<parallel>], iteration_bounds = array<i64: 1, 8>, scalar_prefetch = 0 : i64, scratch_operands = 0 : i64, tpu.core_type = #tpu.core_type<tc>, window_params = [{transform_indices = @transform_0, window_bounds = array<i64: 2, 256>}, {transform_indices = @transform_1, window_bounds = array<i64: 2, 256>}]} {
    %c0 = arith.constant 0 : index
    %c0_0 = arith.constant 0 : index
    %0 = vector.load %arg2[%c0, %c0_0] : memref<2x256xf32, #tpu.memory_space<vmem>>, vector<2x256xf32>
    %cst = arith.constant 0.000000e+00 : f32
    %1 = vector.broadcast %cst : f32 to vector<2x256xf32>
    %2 = arith.cmpf ogt, %0, %1 : vector<2x256xf32>
    %cst_1 = arith.constant -1.500000e-01 : f32
    %3 = vector.broadcast %cst_1 : f32 to vector<2x256xf32>
    %4 = arith.mulf %0, %3 : vector<2x256xf32>
    %5 = arith.select %2, %0, %4 : vector<2x256xi1>, vector<2x256xf32>
    %c0_2 = arith.constant 0 : index
    %c0_3 = arith.constant 0 : index
    %6 = vector.load %arg3[%c0_2, %c0_3] : memref<2x256xf32, #tpu.memory_space<vmem>>, vector<2x256xf32>
    tpu.vector_store %arg3[%c0_2, %c0_3], %5 {strides = array<i32>} : memref<2x256xf32, #tpu.memory_space<vmem>>, vector<2x256xf32>,
    return
  }
  func.func @transform_0(%arg0: i32, %arg1: i32) -> (i32, i32) {
    %c49_i32 = arith.constant 49 : i32
    %0 = arith.addi %c49_i32, %arg1 : i32
    %c0_i32 = arith.constant 0 : i32
    return %arg0, %0 : i32, i32
  }
  func.func @transform_1(%arg0: i32, %arg1: i32) -> (i32, i32) {
    %c49_i32 = arith.constant 49 : i32
    %0 = arith.addi %c49_i32, %arg1 : i32
    %c0_i32 = arith.constant 0 : i32
    return %arg0, %0 : i32, i32
  }
}

</mosaic_0001>

<bundles_post_ra>
// kernel: model_forward.1
= control target key start
LH: loop header
LB: loop body
LE: loop exit
PB: predicated region body
PF: predicated region fallthrough
CT: control target
= control target key end

     0   :  { %s336_s6 = smov 0   ;;  %s338_s7 = smov 0   ;;  %s357_s0 = inlined_call_operand.vmem [shape: f32[2,14592], index: 0, kind: input, shape index: {}, may-alias: {0,1}]   ;;  %s358_s1 = inlined_call_operand.vmem [shape: f32[2,14592], index: 1, kind: output, shape index: {}, may-alias: {0,1}]  }
   0x1   :  { %s340_s8 = smov 0  }
   0x2 LB: > { %s20_s9 = sadd.s32 1, %s320_s7  ;;  %p267_p0 = scmp.ge.s32.totalorder %s324_s8, 1  ;;  %s324_s8 = sphi %s340_s8, %s11_s8   ;;  %s320_s7 = sphi %s338_s7, %s360_s7   ;;  %s316_s6 = sphi %s336_s6, %s359_s6  }
   0x3   : > { %p21_p1 = scmp.ge.s32.totalorder %s20_s9, 8  ;;  %p114_p2 = scmp.lt.s32.totalorder %s324_s8, 9 }
   0x5   : > { %s362_s9 = smov (%p21_p1, %s20_s9), 0  ;;  %p115_p3 = pnand %p267_p0, %p114_p2 }
   0x6   : > { %s274_s10 = sshll.u32 (!%p115_p3), %s316_s6, 1 }
   0x7   : > { %118 = sbr.rel (%p115_p3) target bundleno = 22 (0x16), region = 24  ;;  %s275_s11 = sadd.s32 (!%p115_p3), 98, %s274_s10 }
   0x8   : > { %p148_p4 = scmp.lt.s32.totalorder (!%p115_p3), %s275_s11, 113 }
   0xe   : > { %s364_s11 = smov (!%p148_p4, %s275_s11), 113 }
   0xf   : > { %s269_s12 = sshll.u32 %s364_s11, 1 }
  0x10   : > { %s153_s15 = scalar_lea.vmem %s357_s0, %s269_s12  ;;  %s165_s18 = scalar_lea.vmem %s358_s1, %s269_s12 }
  0x11   : > { %v168_v0 = vld [vmem:[%s153_s15] sm:$0xf] }
  0x12   : > { %vm169_vm0 = vcmp.gt.f32.partialorder %v168_v0, 0.0  ;;  %v170_v1 = vmul.f32 -0.15, %v168_v0 }
  0x14   : > { %v171_v2 = vsel %vm169_vm0, %v168_v0, %v170_v1 }
  0x15   : > { %172 = vst [vmem:[%s165_s18] sm:$0xf] %v171_v2 }
  0x16 PF: > { %s11_s8 = sadd.s32 1, %s324_s8   ;;  %s359_s6 = smov %s320_s7 }
  0x17   : > { %p8_p5 = scmp.ge.s32.totalorder %s11_s8, 10   ;;  %s360_s7 = smov %s362_s9 }
  0x19   :  { %10 = sbr.rel (!%p8_p5) target bundleno = 2 (0x2), region = 54 }

</bundles_post_ra>
